<compile_context>
chip_gen: v5e
topology: v5e:2x2
jax: 0.10.0
libtpu: 0.0.40
codegen_flags: <defaults>
</compile_context>

<pallas_src>
import functools

import jax
import jax.numpy as jnp
from jax.experimental import pallas as pl
from jax.experimental.pallas import tpu as pltpu


def _round_up(x, m):
    return ((x + m - 1) // m) * m


# tm: row tile (weight-stream arithmetic intensity ~ tm FLOP/byte),
# ti: intermediate-dim tile, vmem_cap: scoped-VMEM ceiling we may request.
_TILE_PRESETS = {
    "v5e": dict(tm=256,  ti=512, vmem_cap=100 << 20),   # 128 MiB physical
    "v5p": dict(tm=512,  ti=512, vmem_cap=100 << 20),
    "v6e": dict(tm=1024, ti=256, vmem_cap=100 << 20),   # 128 MiB physical
    "v7x": dict(tm=512,  ti=256, vmem_cap=60 << 20),    # 64 MiB physical
    "unknown": dict(tm=512, ti=256, vmem_cap=60 << 20),
}


def _tpu_generation():
    try:
        kind = jax.devices()[0].device_kind.lower()
    except Exception:
        return "unknown"
    if "v7" in kind or "7x" in kind:
        return "v7x"
    if "v6" in kind:
        return "v6e"
    if "v5" in kind:
        return "v5e" if ("lite" in kind or "5e" in kind) else "v5p"
    return "unknown"


def recommended_ti(intermediate_size):
    """Intermediate-dim tile to bake into prepare_llama_mlp_weights()."""
    preset = _TILE_PRESETS[_tpu_generation()]
    return max(128, min(_round_up(preset["ti"], 128),
                        _round_up(intermediate_size, 128)))


def prepare_llama_mlp_weights(w_gate, w_up, w_down, *, ti):
    """One-time repack of PyTorch nn.Linear weights (call at weight-load time).

    Inputs (PyTorch layout, no bias):
      w_gate, w_up : (I, H)   down : (H, I)
    Returns:
      w_gu     : (H, 2*I_pad)  block-interleaved [gate_k | up_k] per ti-tile,
                 so one (H, 2*ti) BlockSpec feeds a single MXU-native NN matmul.
      w_down_t : (I_pad, H)    contiguous (ti, H) blocks, NN orientation.
    """
    I, H = w_gate.shape
    assert w_up.shape == (I, H) and w_down.shape == (H, I)
    assert ti % 128 == 0
    I_pad = _round_up(I, ti)
    if I_pad != I:
        # Zero-padded intermediate features contribute exactly zero:
        # silu(0) * up = 0 and the padded down-proj rows are zero.
        w_gate = jnp.pad(w_gate, ((0, I_pad - I), (0, 0)))
        w_up = jnp.pad(w_up, ((0, I_pad - I), (0, 0)))
        w_down = jnp.pad(w_down, ((0, 0), (0, I_pad - I)))
    g_t = jnp.transpose(w_gate).reshape(H, I_pad // ti, ti)
    u_t = jnp.transpose(w_up).reshape(H, I_pad // ti, ti)
    w_gu = jnp.concatenate([g_t, u_t], axis=2).reshape(H, 2 * I_pad)
    w_down_t = jnp.transpose(w_down)                      # (I_pad, H)
    return w_gu, w_down_t


def llama_mlp_kernel(x_ref, wgu_ref, wd_ref, o_ref, acc_ref, *, ti):
    # x_ref: (tm, H); wgu_ref: (H, 2*ti) = [gate_k | up_k]; wd_ref: (ti, H)
    # o_ref: (tm, H); acc_ref: (tm, H) f32 scratch, resident across k.
    k = pl.program_id(1)

    @pl.when(k == 0)
    def _():
        acc_ref[...] = jnp.zeros_like(acc_ref)

    x = x_ref[...]
    # Single fused MXU pass: (tm, H) x (H, 2*ti) -> (tm, 2*ti), f32 accumulate.
    gu = jnp.dot(x, wgu_ref[...], preferred_element_type=jnp.float32)
    gate = gu[:, :ti]        # static, lane-aligned slices (ti % 128 == 0)
    up = gu[:, ti:]
    # SiLU (Llama hidden_act="silu") in f32: g * sigmoid(g), then gating.
    h = (gate * jax.nn.sigmoid(gate)) * up                # (tm, ti) f32

    # Partial down-proj: (tm, ti) x (ti, H) -> (tm, H); += right after the dot
    # so Mosaic can use in-place MXU accumulation (MRB) on v7x.
    acc_ref[...] += jnp.dot(h.astype(wd_ref.dtype), wd_ref[...],
                            preferred_element_type=jnp.float32)

    @pl.when(k == pl.num_programs(1) - 1)
    def _():
        o_ref[...] = acc_ref[...].astype(o_ref.dtype)


def llama_mlp(x, w_gu, w_down_t, *, ti, tm=None, vmem_limit_bytes=None):
    """x: (..., H). w_gu/w_down_t from prepare_llama_mlp_weights(..., ti=ti).

    For real Llama sizes pass bf16 x / weights (accumulation is always f32).
    """
    *lead, H = x.shape
    M = 1
    for d in lead:
        M *= d
    I_pad = w_down_t.shape[0]
    assert w_gu.shape == (H, 2 * I_pad) and w_down_t.shape == (I_pad, H)
    assert ti % 128 == 0 and I_pad % ti == 0

    preset = _TILE_PRESETS[_tpu_generation()]
    if tm is None:
        tm = preset["tm"]
    # Never below 16 rows (bf16 sublane packing); keep the preset's MXU-aligned
    # tile for large M.
    tm = max(16, min(_round_up(tm, 16), _round_up(M, 16)))

    M_pad = _round_up(M, tm)
    x2d = x.reshape(M, H)
    if M_pad != M:
        x2d = jnp.pad(x2d, ((0, M_pad - M), (0, 0)))

    grid = (M_pad // tm, I_pad // ti)

    x_bytes = jnp.dtype(x.dtype).itemsize
    w_bytes = jnp.dtype(w_gu.dtype).itemsize
    if vmem_limit_bytes is None:
        # NOTE: x / out blocks are k-invariant; pl.Buffered(1) on them would
        # reclaim ~2*tm*H*itemsize of headroom, left at default double-buffering
        # here for compile robustness.
        per_step = (2 * tm * H * x_bytes            # x tile (double buffered)
                    + 2 * H * (2 * ti) * w_bytes    # fused [gate|up] tile
                    + 2 * ti * H * w_bytes          # down-proj tile
                    + 2 * tm * H * x_bytes          # output tile
                    + tm * H * 4)                   # f32 accumulator scratch
        vmem_limit_bytes = min(preset["vmem_cap"],
                               max(per_step + (2 << 20), 32 << 20))

    cost = pl.CostEstimate(
        flops=6 * M_pad * I_pad * H,
        transcendentals=M_pad * I_pad,
        bytes_accessed=((w_gu.size + w_down_t.size) * w_bytes * grid[0]
                        + x2d.size * x_bytes + M_pad * H * x_bytes),
    )

    out = pl.pallas_call(
        functools.partial(llama_mlp_kernel, ti=ti),
        out_shape=jax.ShapeDtypeStruct((M_pad, H), x.dtype),
        grid_spec=pltpu.PrefetchScalarGridSpec(
            num_scalar_prefetch=0,
            grid=grid,
            in_specs=[
                pl.BlockSpec((tm, H), lambda i, k: (i, 0)),      # x rows (k-invariant)
                pl.BlockSpec((H, 2 * ti), lambda i, k: (0, k)),  # fused [gate_k | up_k]
                pl.BlockSpec((ti, H), lambda i, k: (k, 0)),      # down tile (contiguous)
            ],
            out_specs=pl.BlockSpec((tm, H), lambda i, k: (i, 0)),
            scratch_shapes=[pltpu.VMEM((tm, H), jnp.float32)],
        ),
        compiler_params=pltpu.CompilerParams(
            dimension_semantics=("parallel", "arbitrary"),
            vmem_limit_bytes=int(vmem_limit_bytes),
        ),
        cost_estimate=cost,
    )(x2d, w_gu, w_down_t)

    return out[:M].reshape(x.shape)


if __name__ == "__main__":
    # Small config: hidden_size=128, intermediate_size=256, batch=2, seq=8.
    B, S, H, I = 2, 8, 128, 256

    key = jax.random.PRNGKey(0)
    kx, kg, ku, kd = jax.random.split(key, 4)

    x = jax.random.normal(kx, (B, S, H), dtype=jnp.float32)
    # PyTorch nn.Linear weight layout: (out_features, in_features), no bias.
    w_gate = jax.random.normal(kg, (I, H), dtype=jnp.float32) * 0.02
    w_up = jax.random.normal(ku, (I, H), dtype=jnp.float32) * 0.02
    w_down = jax.random.normal(kd, (H, I), dtype=jnp.float32) * 0.02

    # ti=128 so the I-reduction grid axis has 2 steps and the accumulator
    # init/accumulate/finalize path is exercised at this toy size.
    # (Production: ti = recommended_ti(I), bf16 x / weights.)
    ti = 128
    w_gu, w_down_t = prepare_llama_mlp_weights(w_gate, w_up, w_down, ti=ti)

    out = llama_mlp(x, w_gu, w_down_t, ti=ti)
    out = jax.block_until_ready(out)

    # Reference (plain JAX) for correctness.
    gate = x @ w_gate.T
    up = x @ w_up.T
    ref = (gate * jax.nn.sigmoid(gate) * up) @ w_down.T
    assert out.shape == ref.shape
    assert jnp.allclose(out, ref, atol=1e-4, rtol=1e-4)

    print("KERNEL_OK")
</pallas_src>

<mosaic_0001>
module attributes {stable_mosaic.version = 11 : i64} {
  func.func @llama_mlp_kernel(%arg0: i32, %arg1: i32, %arg2: memref<16x128xf32, #tpu.memory_space<vmem>>, %arg3: memref<128x256xf32, #tpu.memory_space<vmem>>, %arg4: memref<128x128xf32, #tpu.memory_space<vmem>>, %arg5: memref<16x128xf32, #tpu.memory_space<vmem>>, %arg6: memref<16x128xf32, #tpu.memory_space<vmem>>) attributes {dimension_semantics = [#tpu.dimension_semantics<parallel>, #tpu.dimension_semantics<arbitrary>], iteration_bounds = array<i64: 1, 2>, scalar_prefetch = 0 : i64, scratch_operands = 1 : i64, tpu.core_type = #tpu.core_type<tc>, window_params = [{transform_indices = @transform_0, window_bounds = array<i64: 16, 128>}, {transform_indices = @transform_1, window_bounds = array<i64: 128, 256>}, {transform_indices = @transform_2, window_bounds = array<i64: 128, 128>}, {transform_indices = @transform_3, window_bounds = array<i64: 16, 128>}]} {
    %c0_i32 = arith.constant 0 : i32
    %0 = arith.cmpi eq, %arg1, %c0_i32 : i32
    %1 = arith.extui %0 : i1 to i32
    %c0_i32_0 = arith.constant 0 : i32
    %2 = arith.cmpi ne, %1, %c0_i32_0 : i32
    scf.if %2 {
      %cst_13 = arith.constant 0.000000e+00 : f32
      %23 = vector.broadcast %cst_13 : f32 to vector<16x128xf32>
      %c0_14 = arith.constant 0 : index
      %c0_15 = arith.constant 0 : index
      %24 = vector.load %arg6[%c0_14, %c0_15] : memref<16x128xf32, #tpu.memory_space<vmem>>, vector<16x128xf32>
      tpu.vector_store %arg6[%c0_14, %c0_15], %23 {strides = array<i32>} : memref<16x128xf32, #tpu.memory_space<vmem>>, vector<16x128xf32>,
    } else {
    }
    %c0 = arith.constant 0 : index
    %c0_1 = arith.constant 0 : index
    %3 = vector.load %arg2[%c0, %c0_1] : memref<16x128xf32, #tpu.memory_space<vmem>>, vector<16x128xf32>
    %c0_2 = arith.constant 0 : index
    %c0_3 = arith.constant 0 : index
    %4 = vector.load %arg3[%c0_2, %c0_3] : memref<128x256xf32, #tpu.memory_space<vmem>>, vector<128x256xf32>
    %cst = arith.constant dense<0.000000e+00> : vector<16x256xf32>
    %5 = tpu.matmul %3, %4, %cst {dimension_numbers = #tpu.dot_dimension_numbers<[1], [0], [0], [1], [0, 0, 1, 1], [], []>} : vector<16x128xf32>, vector<128x256xf32>, vector<16x256xf32> -> vector<16x256xf32>
    %6 = vector.extract_strided_slice %5 {offsets = [0, 0], sizes = [16, 128], strides = [1, 1]} : vector<16x256xf32> to vector<16x128xf32>
    %7 = vector.extract_strided_slice %5 {offsets = [0, 128], sizes = [16, 128], strides = [1, 1]} : vector<16x256xf32> to vector<16x128xf32>
    %8 = arith.negf %6 : vector<16x128xf32>
    %9 = math.exp %8 : vector<16x128xf32>
    %cst_4 = arith.constant 1.000000e+00 : f32
    %10 = vector.broadcast %cst_4 : f32 to vector<16x128xf32>
    %11 = arith.addf %10, %9 : vector<16x128xf32>
    %12 = arith.divf %10, %11 : vector<16x128xf32>
    %13 = arith.mulf %6, %12 : vector<16x128xf32>
    %14 = arith.mulf %13, %7 : vector<16x128xf32>
    %c0_5 = arith.constant 0 : index
    %c0_6 = arith.constant 0 : index
    %15 = vector.load %arg6[%c0_5, %c0_6] : memref<16x128xf32, #tpu.memory_space<vmem>>, vector<16x128xf32>
    %c0_7 = arith.constant 0 : index
    %c0_8 = arith.constant 0 : index
    %16 = vector.load %arg4[%c0_7, %c0_8] : memref<128x128xf32, #tpu.memory_space<vmem>>, vector<128x128xf32>
    %cst_9 = arith.constant dense<0.000000e+00> : vector<16x128xf32>
    %17 = tpu.matmul %14, %16, %cst_9 {dimension_numbers = #tpu.dot_dimension_numbers<[1], [0], [0], [1], [0, 0, 1, 1], [], []>} : vector<16x128xf32>, vector<128x128xf32>, vector<16x128xf32> -> vector<16x128xf32>
    %18 = arith.addf %15, %17 : vector<16x128xf32>
    %c0_10 = arith.constant 0 : index
    %c0_11 = arith.constant 0 : index
    %19 = vector.load %arg6[%c0_10, %c0_11] : memref<16x128xf32, #tpu.memory_space<vmem>>, vector<16x128xf32>
    tpu.vector_store %arg6[%c0_10, %c0_11], %18 {strides = array<i32>} : memref<16x128xf32, #tpu.memory_space<vmem>>, vector<16x128xf32>,
    %c1_i32 = arith.constant 1 : i32
    %20 = arith.cmpi eq, %arg1, %c1_i32 : i32
    %21 = arith.extui %20 : i1 to i32
    %c0_i32_12 = arith.constant 0 : i32
    %22 = arith.cmpi ne, %21, %c0_i32_12 : i32
    scf.if %22 {
      %c0_13 = arith.constant 0 : index
      %c0_14 = arith.constant 0 : index
      %23 = vector.load %arg6[%c0_13, %c0_14] : memref<16x128xf32, #tpu.memory_space<vmem>>, vector<16x128xf32>
      %c0_15 = arith.constant 0 : index
      %c0_16 = arith.constant 0 : index
      %24 = vector.load %arg5[%c0_15, %c0_16] : memref<16x128xf32, #tpu.memory_space<vmem>>, vector<16x128xf32>
      tpu.vector_store %arg5[%c0_15, %c0_16], %23 {strides = array<i32>} : memref<16x128xf32, #tpu.memory_space<vmem>>, vector<16x128xf32>,
    } else {
    }
    return
  }
  func.func @transform_0(%arg0: i32, %arg1: i32) -> (i32, i32) {
    %c0_i32 = arith.constant 0 : i32
    %c0_i32_0 = arith.constant 0 : i32
    return %arg0, %c0_i32 : i32, i32
  }
  func.func @transform_1(%arg0: i32, %arg1: i32) -> (i32, i32) {
    %c0_i32 = arith.constant 0 : i32
    %c0_i32_0 = arith.constant 0 : i32
    return %c0_i32, %arg1 : i32, i32
  }
  func.func @transform_2(%arg0: i32, %arg1: i32) -> (i32, i32) {
    %c0_i32 = arith.constant 0 : i32
    %c0_i32_0 = arith.constant 0 : i32
    return %arg1, %c0_i32 : i32, i32
  }
  func.func @transform_3(%arg0: i32, %arg1: i32) -> (i32, i32) {
    %c0_i32 = arith.constant 0 : i32
    %c0_i32_0 = arith.constant 0 : i32
    return %arg0, %c0_i32 : i32, i32
  }
}

</mosaic_0001>

<bundles_post_ra>
// kernel: tpu_custom_call.1
= control target key start
LH: loop header
LB: loop body
LE: loop exit
PB: predicated region body
PF: predicated region fallthrough
CT: control target
= control target key end

     0   :  { %8 = vsyncpa [#allocation4], 0  ;;  %s1082_s0 = inlined_call_operand.hbm [shape: f32[16,128], index: 0, kind: input, shape index: {}]   ;;  %s1083_s1 = inlined_call_operand.hbm [shape: f32[128,512], index: 1, kind: input, shape index: {}]   ;;  %s1084_s2 = inlined_call_operand.hbm [shape: f32[256,128], index: 2, kind: input, shape index: {}]   ;;  %s1085_s3 = inlined_call_operand.hbm [shape: f32[16,128], index: 3, kind: output, shape index: {}]  }
   0x1   :  { %9 = vsyncpa [#allocation7], 0 }
   0x2   :  { %11 = vsyncpa [#allocation7 + $0x1], 0 }
   0x3   :  { %12 = vsyncpa [#allocation5], 0  ;;  %s896_s12 = smov 0   ;;  %s898_s13 = smov 0  }
   0x4   :  { %s900_s14 = smov 0   ;;  %s902_s15 = smov 0  }
   0x5   :  { %s904_s16 = smov 0   ;;  %s906_s17 = smov 0  }
   0x6 LB: > { %s27_s18 = sadd.s32 1, %s860_s16  ;;  %s63_s19 = sadd.s32 1, %s852_s14  ;;  %s864_s17 = sphi %s906_s17, %s18_s17   ;;  %s860_s16 = sphi %s904_s16, %s1094_s16   ;;  %s856_s15 = sphi %s902_s15, %s1093_s15   ;;  %s852_s14 = sphi %s900_s14, %s1092_s14   ;;  %s848_s13 = sphi %s898_s13, %s1091_s13   ;;  %s844_s12 = sphi %s896_s12, %s1090_s12  }
   0x7   : > { %p28_p0 = scmp.ge.s32.totalorder %s27_s18, 2  ;;  %p70_p1 = scmp.ne.s32.totalorder %s852_s14, %s848_s13 }
   0x8   : > { %p71_p2 = scmp.eq.s32.totalorder %s864_s17, 0  ;;  %p618_p4 = scmp.lt.s32.totalorder %s864_s17, 2 }
   0x9   : > { %s1096_s18 = smov (%p28_p0, %s27_s18), 0  ;;  %s169_s22 = sand.u32 1, %s864_s17  }
   0xa   : > { %p933_p3 = por %p71_p2, %p70_p1  ;;  %s60_s21 = ssub.s32 %s860_s16, %s1096_s18 }
   0xb   : > { %p61_p5 = scmp.eq.s32.totalorder %s60_s21, 0  ;;  %s171_s23 = sand.u32 1, %s852_s14  }
   0xc   : > { %s576_s24 = sshll.u32 %s860_s16, 4  ;;  %s558_s26 = sshll.u32 %s171_s23, 8 }
   0xd   : > { %s944_s25 = scalar_select %p61_p5, %s852_s14, %s63_s19  }
   0xe   : > { %s178_s29 = scalar_lea.hbm %s1083_s1, %s576_s24  ;;  %s173_s4 = scalar_lea.vmem [#allocation6], %s558_s26 }
   0xf   : > { %s179_s30 = sshll.u32 %s178_s29, 4  ;;  %s181_s5 = sshll.u32 %s173_s4, 4  ;;  %s180_s30 = int_to_ptr.hbm [resolvable:$true] %s179_s30  ;;  %s182_s5 = int_to_ptr.vmem [resolvable:$true] %s181_s5 }
  0x10   : > { %p953_p6 = pnand %p618_p4, %p933_p3  ;;  %s957_s7 = scalar_lea.sflag [#allocation7], %s169_s22 }
  0x11   : > { %s866_s8 = smov 512   ;;  %s867_s9 = smov 256  }
  0x12   : > { %s868_s10 = smov 16   ;;  %s963_s11 = sadd.s32 4294967295, %s864_s17  }
  0x13   : > { %613 = dma.hbm_to_vmem [thread:$0]  (!%p953_p6), %s180_s30, 4096, %s182_s5, %s957_s7, %s866_s8, %s867_s9, %s868_s10  }
  0x14   : > { %p76_p7 = scmp.ne.s32.totalorder %s848_s13, %s844_s12  ;;  %p77_p8 = scmp.eq.s32.totalorder %s963_s11, 0 }
  0x15   : > { %p555_p9 = scmp.ge.s32.totalorder %s864_s17, 1  ;;  %p139_p10 = scmp.lt.s32.totalorder %s864_s17, 3 }
  0x16   : > { %p972_p11 = por %p77_p8, %p76_p7  ;;  %s153_s22 = sshll.u32 %s1082_s0, 4  ;;  %s154_s22 = int_to_ptr.hbm [resolvable:$true] %s153_s22 }
  0x17   : > { %p979_p12 = pnand %p555_p9, %p139_p10  ;;  %s869_s12 = smov [#allocation3]  }
  0x18   : > { %s155_s26 = sshll.u32 %s869_s12, 4  ;;  %s561_s27 = sshll.u32 %s171_s23, 7  ;;  %s156_s26 = int_to_ptr.vmem [resolvable:$true] %s155_s26 }
  0x19   : > { %p606_p13 = pneg %p979_p12  ;;  %s577_s28 = sshll.u32 %s860_s16, 7 }
  0x1a   : > { %s200_s4 = scalar_lea.hbm %s1084_s2, %s577_s28  ;;  %s870_s5 = smov 128  }
  0x1b   : > { %p607_p0 = pnand %p606_p13, %p77_p8  ;;  %s871_s8 = smov 8  }
  0x1c   : > { %s201_s9 = sshll.u32 %s200_s4, 4  ;;  %s195_s10 = scalar_lea.vmem [#allocation8], %s561_s27  ;;  %s202_s9 = int_to_ptr.hbm [resolvable:$true] %s201_s9 }
  0x1d   : > { %609 = dma.hbm_to_vmem [thread:$0]  (!%p607_p0), %s154_s22, 256, %s156_s26, [#allocation4], %s870_s5, %s870_s5, %s871_s8  }
  0x1e   : > { %s203_s20 = sshll.u32 %s195_s10, 4  ;;  %215 = sbr.rel (%p979_p12) target bundleno = 397 (0x18d), region = 32  ;;  %s204_s20 = int_to_ptr.vmem [resolvable:$true] %s203_s20 }
  0x1f   : > { %616 = dma.hbm_to_vmem [thread:$0]  (!%p953_p6), %s202_s9, 2048, %s204_s20, %s957_s7, %s870_s5, %s870_s5, %s871_s8  }
  0x23   : > { %831 = dma.done.wait (%p77_p8), [#allocation4], 256  }
  0x24   : > { %833 = vsyncadd (%p77_p8), [#allocation4], 4294967040  ;;  %s222_s23 = sand.u32 1, %s963_s11   ;;  %s224_s21 = sand.u32 1, %s848_s13  }
  0x25   : > { %s566_s22 = sshll.u32 %s224_s21, 8  ;;  %s223_s12 = scalar_lea.sflag [#allocation7], %s222_s23 }
  0x26   : > { %s1002_s26 = scalar_lea.vmem [#allocation6], %s566_s22 }
  0x27   : > { %835 = dma.done.wait (%p972_p11), %s223_s12, 6144  }
  0x28   : > { %837 = vsyncadd (%p972_p11), %s223_s12, 4294961152  ;;  %s567_s6 = sshll.u32 %s224_s21, 7  ;;  %p568_p1 = scmp.ne.s32.totalorder %s856_s15, 0 }
  0x29   : > { %s1008_s7 = scalar_lea.vmem [#allocation8], %s567_s6 }
  0x2a   : > { %267 = sbr.rel (%p568_p1) target bundleno = 50 (0x32), region = 48 }
  0x2f   : > { %v872_v0 = vmov 0.0  }
  0x30   : > { %268 = vst [vmem:[#allocation2] sm:$0xff] %v872_v0 }
  0x31   : > { %269 = vst [vmem:[#allocation2 + $0x8] sm:$0xff] %v872_v0 }
  0x32 PF: > { %v302_v1 = vld [vmem:[%s1002_s26 + $0xf0] sm:$0xff]  ;;  %v300_v2 = vld [vmem:[%s1002_s26 + $0xe0] sm:$0xff]  ;;  %v303_v5 = vld [vmem:[%s1002_s26 + $0xf8] sm:$0xff]  ;;  %p571_p2 = scmp.ne.s32.totalorder %s856_s15, 1 }
  0x33   : > { %304 = vmatpush.msra.mxu0 %v302_v1  ;;  %578 = vmatpush.msra.mxu3 %v302_v1  ;;  %v298_v3 = vld [vmem:[%s1002_s26 + $0xd0] sm:$0xff]  ;;  %v296_v4 = vld [vmem:[%s1002_s26 + $0xc0] sm:$0xff]  ;;  %v301_v6 = vld [vmem:[%s1002_s26 + $0xe8] sm:$0xff] }
  0x34   : > { %v294_v7 = vld [vmem:[%s1002_s26 + $0xb0] sm:$0xff]  ;;  %327 = vmatpush.msra.mxu1 %v303_v5  ;;  %v299_v8 = vld [vmem:[%s1002_s26 + $0xd8] sm:$0xff]  ;;  %v292_v9 = vld [vmem:[%s1002_s26 + $0xa0] sm:$0xff] }
  0x35   : > { %305 = vmatpush.msra.mxu0 %v300_v2  ;;  %579 = vmatpush.msra.mxu3 %v300_v2  ;;  %v297_v10 = vld [vmem:[%s1002_s26 + $0xc8] sm:$0xff]  ;;  %v290_v11 = vld [vmem:[%s1002_s26 + $0x90] sm:$0xff]  ;;  %v295_v12 = vld [vmem:[%s1002_s26 + $0xb8] sm:$0xff] }
  0x36   : > { %328 = vmatpush.msra.mxu1 %v301_v6  ;;  %v288_v13 = vld [vmem:[%s1002_s26 + $0x80] sm:$0xff]  ;;  %v293_v14 = vld [vmem:[%s1002_s26 + $0xa8] sm:$0xff]  ;;  %v286_v15 = vld [vmem:[%s1002_s26 + $0x70] sm:$0xff] }
  0x37   : > { %306 = vmatpush.msra.mxu0 %v298_v3  ;;  %580 = vmatpush.msra.mxu3 %v298_v3  ;;  %v291_v16 = vld [vmem:[%s1002_s26 + $0x98] sm:$0xff]  ;;  %v284_v17 = vld [vmem:[%s1002_s26 + $0x60] sm:$0xff]  ;;  %v289_v18 = vld [vmem:[%s1002_s26 + $0x88] sm:$0xff] }
  0x38   : > { %329 = vmatpush.msra.mxu1 %v299_v8  ;;  %v282_v19 = vld [vmem:[%s1002_s26 + $0x50] sm:$0xff]  ;;  %v287_v20 = vld [vmem:[%s1002_s26 + $0x78] sm:$0xff]  ;;  %v280_v21 = vld [vmem:[%s1002_s26 + $0x40] sm:$0xff] }
  0x39   : > { %307 = vmatpush.msra.mxu0 %v296_v4  ;;  %581 = vmatpush.msra.mxu3 %v296_v4  ;;  %v285_v22 = vld [vmem:[%s1002_s26 + $0x68] sm:$0xff]  ;;  %v278_v23 = vld [vmem:[%s1002_s26 + $0x30] sm:$0xff]  ;;  %v283_v24 = vld [vmem:[%s1002_s26 + $0x58] sm:$0xff] }
  0x3a   : > { %330 = vmatpush.msra.mxu1 %v297_v10  ;;  %v276_v25 = vld [vmem:[%s1002_s26 + $0x20] sm:$0xff]  ;;  %v281_v26 = vld [vmem:[%s1002_s26 + $0x48] sm:$0xff]  ;;  %v274_v27 = vld [vmem:[%s1002_s26 + $0x10] sm:$0xff] }
  0x3b   : > { %308 = vmatpush.msra.mxu0 %v294_v7  ;;  %582 = vmatpush.msra.mxu3 %v294_v7  ;;  %v279_v28 = vld [vmem:[%s1002_s26 + $0x38] sm:$0xff]  ;;  %v272_v29 = vld [vmem:[%s1002_s26] sm:$0xff]  ;;  %v270_v30 = vld [vmem:[#allocation3] sm:$0xff] }
  0x3c   : > { %331 = vmatpush.msra.mxu1 %v295_v12  ;;  %v271_v31 = vld [vmem:[#allocation3 + $0x8] sm:$0xff]  ;;  %v277_v32 = vld [vmem:[%s1002_s26 + $0x28] sm:$0xff]  ;;  %v408_v36 = vld [vmem:[%s1008_s7 + $0x70] sm:$0xff] }
  0x3d   : > { %309 = vmatpush.msra.mxu0 %v292_v9  ;;  %583 = vmatpush.msra.mxu3 %v292_v9  ;;  %v275_v33 = vld [vmem:[%s1002_s26 + $0x18] sm:$0xff]  ;;  %v273_v34 = vld [vmem:[%s1002_s26 + $0x8] sm:$0xff]  ;;  %v406_v38 = vld [vmem:[%s1008_s7 + $0x60] sm:$0xff] }
  0x3e   : > { %332 = vmatpush.msra.mxu1 %v293_v14  ;;  %v409_v35 = vld [vmem:[%s1008_s7 + $0x78] sm:$0xff]  ;;  %v407_v37 = vld [vmem:[%s1008_s7 + $0x68] sm:$0xff]  ;;  %v404_v40 = vld [vmem:[%s1008_s7 + $0x50] sm:$0xff] }
  0x3f   : > { %310 = vmatpush.msra.mxu0 %v290_v11  ;;  %584 = vmatpush.msra.mxu3 %v290_v11  ;;  %v405_v39 = vld [vmem:[%s1008_s7 + $0x58] sm:$0xff]  ;;  %v403_v41 = vld [vmem:[%s1008_s7 + $0x48] sm:$0xff]  ;;  %v402_v42 = vld [vmem:[%s1008_s7 + $0x40] sm:$0xff] }
  0x40   : > { %333 = vmatpush.msra.mxu1 %v291_v16  ;;  %410 = vmatpush.msra.mxu2 %v409_v35  ;;  %v401_v43 = vld [vmem:[%s1008_s7 + $0x38] sm:$0xff]  ;;  %v400_v44 = vld [vmem:[%s1008_s7 + $0x30] sm:$0xff]  ;;  %v399_v45 = vld [vmem:[%s1008_s7 + $0x28] sm:$0xff] }
  0x41   : > { %311 = vmatpush.msra.mxu0 %v288_v13  ;;  %585 = vmatpush.msra.mxu3 %v288_v13  ;;  %v398_v46 = vld [vmem:[%s1008_s7 + $0x20] sm:$0xff]  ;;  %v397_v47 = vld [vmem:[%s1008_s7 + $0x18] sm:$0xff]  ;;  %v396_v48 = vld [vmem:[%s1008_s7 + $0x10] sm:$0xff] }
  0x42   : > { %334 = vmatpush.msra.mxu1 %v289_v18  ;;  %411 = vmatpush.msra.mxu2 %v408_v36  ;;  %v395_v49 = vld [vmem:[%s1008_s7 + $0x8] sm:$0xff]  ;;  %v394_v50 = vld [vmem:[%s1008_s7] sm:$0xff] }
  0x43   : > { %312 = vmatpush.msra.mxu0 %v286_v15  ;;  %586 = vmatpush.msra.mxu3 %v286_v15 }
  0x44   : > { %335 = vmatpush.msra.mxu1 %v287_v20  ;;  %412 = vmatpush.msra.mxu2 %v407_v37 }
  0x45   : > { %313 = vmatpush.msra.mxu0 %v284_v17  ;;  %587 = vmatpush.msra.mxu3 %v284_v17 }
  0x46   : > { %336 = vmatpush.msra.mxu1 %v285_v22  ;;  %413 = vmatpush.msra.mxu2 %v406_v38 }
  0x47   : > { %314 = vmatpush.msra.mxu0 %v282_v19  ;;  %588 = vmatpush.msra.mxu3 %v282_v19 }
  0x48   : > { %337 = vmatpush.msra.mxu1 %v283_v24  ;;  %414 = vmatpush.msra.mxu2 %v405_v39  ;;  %v393_v24 = vld [vmem:[#allocation2 + $0x8] sm:$0xff] }
  0x49   : > { %315 = vmatpush.msra.mxu0 %v280_v21  ;;  %589 = vmatpush.msra.mxu3 %v280_v21  ;;  %v392_v21 = vld [vmem:[#allocation2] sm:$0xff] }
  0x4a   : > { %338 = vmatpush.msra.mxu1 %v281_v26  ;;  %415 = vmatpush.msra.mxu2 %v404_v40 }
  0x4b   : > { %316 = vmatpush.msra.mxu0 %v278_v23  ;;  %590 = vmatpush.msra.mxu3 %v278_v23 }
  0x4c   : > { %339 = vmatpush.msra.mxu1 %v279_v28  ;;  %416 = vmatpush.msra.mxu2 %v403_v41 }
  0x4d   : > { %317 = vmatpush.msra.mxu0 %v276_v25  ;;  %591 = vmatpush.msra.mxu3 %v276_v25 }
  0x4e   : > { %340 = vmatpush.msra.mxu1 %v277_v32  ;;  %417 = vmatpush.msra.mxu2 %v402_v42 }
  0x4f   : > { %318 = vmatpush.msra.mxu0 %v274_v27  ;;  %592 = vmatpush.msra.mxu3 %v274_v27 }
  0x50   : > { %341 = vmatpush.msra.mxu1 %v275_v33  ;;  %418 = vmatpush.msra.mxu2 %v401_v43 }
  0x51   : > { %319 = vmatpush.msra.mxu0 %v272_v29  ;;  %593 = vmatpush.msra.mxu3 %v272_v29 }
  0x52   : > { %320 = vmatmul.f32.vlgmr.msra.gmra.mxu0 %v270_v30  ;;  %323 = vmatmul.f32.vlgmr.msra.gmra.mxu3 %v271_v31 }
  0x53   : > { %342 = vmatpush.msra.mxu1 %v273_v34  ;;  %419 = vmatpush.msra.mxu2 %v400_v44 }
  0x54   : > { %343 = vmatmul.f32.vlgmr.msra.gmra.mxu1 %v270_v30 }
  0x55   : > { %420 = vmatpush.msra.mxu2 %v399_v45 }
  0x57   : > { %421 = vmatpush.msra.mxu2 %v398_v46 }
  0x59   : > { %422 = vmatpush.msra.mxu2 %v397_v47 }
  0x5b   : > { %423 = vmatpush.msra.mxu2 %v396_v48 }
  0x5c   : > { %346 = vmatmul.f32.gmra.mxu1 %v271_v31 }
  0x5d   : > { %424 = vmatpush.msra.mxu2 %v395_v49 }
  0x5f   : > { %425 = vmatpush.msra.mxu2 %v394_v50 }
  0xcf   : > { %v321_v51 = vpop.f32.mrf.mxu0 }
  0xd0   : > { %v569_v52 = vmul.f32 -1.442695, %v321_v51 }
  0xd1   : > { %v344_v5 = vpop.f32.mrf.mxu1 }
  0xd2   : > { %680 = vpow2.f32 %v569_v52 }
  0xd5   : > { %v324_v53 = vpop.f32.mrf.mxu3 }
  0xd6   : > { %v570_v54 = vmul.f32 -1.442695, %v324_v53 }
  0xd8   : > { %v681_v55 = vpop.eup %680  ;;  %682 = vpow2.f32 %v570_v54 }
  0xd9   : > { %v356_v56 = vadd.f32 1.0, %v681_v55  ;;  %v347_v19 = vpop.f32.mrf.mxu1 }
  0xdb   : > { %684 = vrcp.f32 %v356_v56  ;;  %v369_v62 = vand.u32 2147483648, %v356_v56  ;;  %v367_v0 = vand.u32 2147483647, %v356_v56  ;;  %vm363_vm1 = vweird.f32 %v356_v56 }
  0xdd   : > { %v370_v4 = vor.u32 1.1754944e-38, %v369_v62  ;;  %vm368_vm3 = vcmp.eq.f32.partialorder %v367_v0, 8.507059e+37 }
  0xde   : > { %v683_v57 = vpop.eup %682 }
  0xdf   : > { %v357_v58 = vadd.f32 1.0, %v683_v57 }
  0xe1   : > { %v685_v59 = vpop.eup %684  ;;  %686 = vrcp.f32 %v357_v58  ;;  %v384_v9 = vand.u32 2147483648, %v357_v58  ;;  %v382_v12 = vand.u32 2147483647, %v357_v58  ;;  %vm378_vm5 = vweird.f32 %v357_v58 }
  0xe2   : > { %v359_v60 = vmul.f32 %v685_v59, %v356_v56  ;;  %vm364_vm0 = vweird.f32 %v685_v59 }
  0xe3   : > { %vm365_vm2 = vmor %vm363_vm1, %vm364_vm0  ;;  %v385_v15 = vor.u32 1.1754944e-38, %v384_v9  ;;  %vm383_vm7 = vcmp.eq.f32.partialorder %v382_v12, 8.507059e+37 }
  0xe4   : > { %v360_v61 = vsub.f32 1.0, %v359_v60 }
  0xe6   : > { %v361_v63 = vmul.f32 %v685_v59, %v360_v61 }
  0xe7   : > { %v687_v1 = vpop.eup %686 }
  0xe8   : > { %v362_v2 = vadd.f32 %v685_v59, %v361_v63  ;;  %v374_v3 = vmul.f32 %v687_v1, %v357_v58  ;;  %vm379_vm4 = vweird.f32 %v687_v1 }
  0xe9   : > { %vm380_vm6 = vmor %vm378_vm5, %vm379_vm4 }
  0xea   : > { %v366_v6 = vsel %vm365_vm2, %v685_v59, %v362_v2  ;;  %v375_v7 = vsub.f32 1.0, %v374_v3 }
  0xeb   : > { %v371_v8 = vsel %vm368_vm3, %v370_v4, %v366_v6 }
  0xec   : > { %v388_v10 = vmul.f32 %v371_v8, %v321_v51  ;;  %v376_v11 = vmul.f32 %v687_v1, %v375_v7 }
  0xee   : > { %v377_v13 = vadd.f32 %v687_v1, %v376_v11  ;;  %v390_v14 = vmul.f32 %v388_v10, %v344_v5 }
  0xf0   : > { %v381_v16 = vsel %vm380_vm6, %v687_v1, %v377_v13  ;;  %426 = vmatmul.f32.vlgmr.msra.gmra.mxu2 %v390_v14 }
  0xf1   : > { %v386_v17 = vsel %vm383_vm7, %v385_v15, %v381_v16 }
  0xf2   : > { %v389_v18 = vmul.f32 %v386_v17, %v324_v53 }
  0xf4   : > { %v391_v20 = vmul.f32 %v389_v18, %v347_v19 }
  0xf8   : > { %429 = vmatmul.f32.gmra.mxu2 %v391_v20 }
 0x173   : > { %v427_v22 = vpop.f32.mrf.mxu2 }
 0x174   : > { %v433_v23 = vadd.f32 %v427_v22, %v392_v21 }
 0x176   : > { %435 = vst [vmem:[#allocation2] sm:$0xff] %v433_v23 }
 0x17a   : > { %440 = sbr.rel (%p571_p2) target bundleno = 391 (0x187), region = 52 }
 0x17b   : > { %v430_v25 = vpop.f32.mrf.mxu2 }
 0x17c   : > { %v434_v26 = vadd.f32 %v430_v25, %v393_v24 }
 0x17e   : > { %436 = vst [vmem:[#allocation2 + $0x8] sm:$0xff] %v434_v26 }
 0x17f   : > { %v441_v27 = vld [vmem:[#allocation2] sm:$0xff] }
 0x180   : > { %443 = vst [vmem:[#allocation9] sm:$0xff] %v441_v27 }
 0x185   : > { %v442_v28 = vld [vmem:[#allocation2 + $0x8] sm:$0xff] }
 0x186   : > { %444 = vst [vmem:[#allocation9 + $0x8] sm:$0xff] %v442_v28 }
 0x187 PF: > { %p620_p3 = scmp.eq.s32.totalorder %s963_s11, 1  ;;  %s455_s27 = sshll.u32 %s1085_s3, 4  ;;  %s456_s27 = int_to_ptr.hbm [resolvable:$true] %s455_s27 }
 0x188   : > { %s873_s28 = smov [#allocation9]   ;;  %s874_s30 = smov 128  }
 0x189   : > { %s453_s29 = sshll.u32 %s873_s28, 4  ;;  %s875_s4 = smov 8   ;;  %s454_s29 = int_to_ptr.vmem [resolvable:$true] %s453_s29 }
 0x18a   : > { %603 = dma.vmem_to_hbm [thread:$0]  (%p620_p3), %s454_s29, 256, %s456_s27, [#allocation5], %s874_s30, %s874_s30, %s875_s4  }
 0x18b   : > { %839 = dma.done.wait (%p620_p3), [#allocation5], 256  }
 0x18c   : > { %841 = vsyncadd (%p620_p3), [#allocation5], 4294967040 }
 0x18d PF: > { %s18_s17 = sadd.s32 1, %s864_s17   ;;  %s1090_s12 = smov %s848_s13 }
 0x18e   : > { %p15_p4 = scmp.ge.s32.totalorder %s18_s17, 4   ;;  %s1091_s13 = smov %s852_s14 }
 0x18f   : > { %s1092_s14 = smov %s944_s25  ;;  %s1093_s15 = smov %s860_s16 }
 0x190   : > { %s1094_s16 = smov %s1096_s18  ;;  %17 = sbr.rel (!%p15_p4) target bundleno = 6 (0x6), region = 95 }
 0x195   :  { %472 = vsyncpa [#allocation4], 1 }
 0x196   :  { %474 = vsyncpa [#allocation4 + $0x1], 1 }
 0x197   :  { %475 = vsyncpa [#allocation7], 1 }
 0x198   :  { %477 = vsyncpa [#allocation7 + $0x1], 1 }
 0x199   :  { %478 = vsyncpa [#allocation5], 1 }
 0x19a   :  { %480 = vsyncpa [#allocation5 + $0x1], 1 }

</bundles_post_ra>
